<compile_context>
chip_gen: v7x
topology: tpu7x:2x2x1
jax: 0.10.0
libtpu: 0.0.40
codegen_flags: <defaults>
</compile_context>

<pallas_src>
import functools

import jax
import jax.numpy as jnp
from jax.experimental import pallas as pl
from jax.experimental.pallas import tpu as pltpu


def _round_up(a: int, b: int) -> int:
    return (a + b - 1) // b * b


_NEG = -1e30  # sentinel bias for invalid time steps; ReLU clamps these to 0.


def _conv_pool_fc(x, w_conv, bias_mask, w_fc, b_fc, *, Kmax, L):
    """Shared conv -> ReLU(+validity) -> time-max -> FC stage.

    x        : (TB*L, D)      f32  embedded tokens for this batch block
    w_conv   : (Kmax*D, Fpad) bf16 stacked conv weights (tap-major, zero padded)
    bias_mask: (L, Fpad)      f32  conv bias where time step valid, -1e30 otherwise
    w_fc     : (Fpad, Cpad)   bf16
    b_fc     : (1, Cpad)      f32
    returns  : (TB, Cpad)     f32  logits
    """
    TBL, D = x.shape
    TB = TBL // L
    Fpad = w_conv.shape[-1]

    # im2col along lanes: col[r, k*D + d] = x[r + k, d].  The shift is an XLU
    # rotate (near-free filler).  Rows that wrap or cross a batch boundary only
    # contribute to time steps whose bias is -1e30, so ReLU zeroes them.
    cols = [x.astype(jnp.bfloat16)]
    for k in range(1, Kmax):
        cols.append(pltpu.roll(x, shift=TBL - k, axis=0).astype(jnp.bfloat16))
    col = jnp.concatenate(cols, axis=1)                          # (TBL, Kmax*D) bf16

    # One fat MXU matmul: every conv, every tap, at once.
    acc = jnp.dot(col, w_conv, preferred_element_type=jnp.float32)   # (TBL, Fpad) f32

    # Bias + validity fold + ReLU, then max-pool over time (post-ReLU >= 0, so
    # the zeroed invalid positions can tie but never exceed the true max).
    acc = jnp.maximum(acc.reshape(TB, L, Fpad) + bias_mask[None], 0.0)
    pooled = jnp.max(acc, axis=1)                                # (TB, Fpad)

    # Dropout is identity in eval mode.
    return jnp.dot(pooled.astype(jnp.bfloat16), w_fc,
                   preferred_element_type=jnp.float32) + b_fc    # (TB, Cpad)


def _cnn_text_fused_kernel(idx_ref, embed_ref, w_conv_ref, bmask_ref,
                           w_fc_ref, b_fc_ref, out_ref, *, Kmax, L):
    """One grid step == one TB-row batch block, embedding gather fused in-kernel
    (one-hot @ table on the MXU — small-vocab path)."""
    TBL = idx_ref.shape[0]
    Vpad = embed_ref.shape[0]
    one_hot = (idx_ref[...] ==
               jax.lax.broadcasted_iota(jnp.int32, (TBL, Vpad), 1)
               ).astype(jnp.bfloat16)                            # (TBL, Vpad)
    x = jnp.dot(one_hot, embed_ref[...],
                preferred_element_type=jnp.float32)              # (TBL, D) f32 (exact)
    out_ref[...] = _conv_pool_fc(x, w_conv_ref[...], bmask_ref[...],
                                 w_fc_ref[...], b_fc_ref[...], Kmax=Kmax, L=L)


def _cnn_text_gathered_kernel(x_ref, w_conv_ref, bmask_ref,
                              w_fc_ref, b_fc_ref, out_ref, *, Kmax, L):
    """Fallback for large vocabularies: embeddings gathered outside (bf16 slab)."""
    x = x_ref[...].astype(jnp.float32)                           # (TBL, D)
    out_ref[...] = _conv_pool_fc(x, w_conv_ref[...], bmask_ref[...],
                                 w_fc_ref[...], b_fc_ref[...], Kmax=Kmax, L=L)


def cnn_text_forward(x_idx, embed_w, conv_ws, conv_bs, w_fc, b_fc, Ks, *,
                     block_b=256, fuse_embed_max_vocab=2048):
    """Full CNN_Text forward (eval mode)."""
    Ks = tuple(int(k) for k in Ks)
    N, L = x_idx.shape
    V, D = embed_w.shape
    Co = conv_ws[0].shape[-1]
    C = w_fc.shape[-1]
    Kmax = max(Ks)
    F = len(Ks) * Co
    Fpad = _round_up(F, 128)       # conv output channels padded to full lanes
    Cpad = _round_up(C, 128)       # class dim padded to full lanes (lane-dense stores)

    # --- batch tiling: TB rows per grid step; keep >=2 steps when the batch allows
    #     it so the 'parallel' axis actually shards across v7x's two TensorCores ---
    n8 = _round_up(N, 8)
    TB = min(block_b, n8)
    if TB == n8 and n8 >= 16:
        TB = _round_up(n8 // 2, 8)
    N_pad = _round_up(N, TB)
    n_blocks = N_pad // TB

    # --- host-side packing of the (tiny) weights / bias+validity mask ---
    w_all = jnp.zeros((Kmax * D, Fpad), jnp.float32)
    bias_mask = jnp.full((L, Fpad), _NEG, jnp.float32)
    t_idx = jnp.arange(L)[:, None]                               # (L, 1)
    for j, (K, w, b) in enumerate(zip(Ks, conv_ws, conv_bs)):
        c0 = j * Co
        # w[k, d, c] -> w_all[k*D + d, j*Co + c]; taps k >= K stay zero.
        w_all = w_all.at[:K * D, c0:c0 + Co].set(
            w.astype(jnp.float32).reshape(K * D, Co))
        col_bias = jnp.broadcast_to(b.reshape(1, Co).astype(jnp.float32), (L, Co))
        valid = t_idx < (L - K + 1)                              # Lout_j = L - K + 1
        bias_mask = bias_mask.at[:, c0:c0 + Co].set(jnp.where(valid, col_bias, _NEG))
    w_all = w_all.astype(jnp.bfloat16)

    w_fc_p = jnp.zeros((Fpad, Cpad), jnp.float32).at[:F, :C].set(
        w_fc.astype(jnp.float32)).astype(jnp.bfloat16)
    b_fc_p = jnp.zeros((1, Cpad), jnp.float32).at[:, :C].set(
        b_fc.reshape(1, C).astype(jnp.float32))

    # Pad batch with token-0 rows (their logits are sliced off below).
    x_idx_p = jnp.pad(x_idx.astype(jnp.int32), ((0, N_pad - N), (0, 0)))

    common_specs = [
        pl.BlockSpec((Kmax * D, Fpad), lambda i: (0, 0)),        # resident constants
        pl.BlockSpec((L, Fpad), lambda i: (0, 0)),
        pl.BlockSpec((Fpad, Cpad), lambda i: (0, 0)),
        pl.BlockSpec((1, Cpad), lambda i: (0, 0)),
    ]
    out_spec = pl.BlockSpec((TB, Cpad), lambda i: (i, 0))
    out_shape = jax.ShapeDtypeStruct((N_pad, Cpad), jnp.float32)
    cparams = pltpu.CompilerParams(
        dimension_semantics=("parallel",),   # batch-block axis shards across TCs
        vmem_limit_bytes=32 * 1024 * 1024,
    )

    if V <= fuse_embed_max_vocab:
        # Fused embedding gather: only int32 indices cross HBM per block.
        Vpad = _round_up(V, 8)
        embed_p = jnp.zeros((Vpad, D), jnp.float32).at[:V].set(
            embed_w.astype(jnp.float32)).astype(jnp.bfloat16)
        idx_flat = x_idx_p.reshape(N_pad * L, 1)
        kernel = functools.partial(_cnn_text_fused_kernel, Kmax=Kmax, L=L)
        out = pl.pallas_call(
            kernel,
            out_shape=out_shape,
            grid=(n_blocks,),
            in_specs=[pl.BlockSpec((TB * L, 1), lambda i: (i, 0)),
                      pl.BlockSpec((Vpad, D), lambda i: (0, 0))] + common_specs,
            out_specs=out_spec,
            compiler_params=cparams,
        )(idx_flat, embed_p, w_all, bias_mask, w_fc_p, b_fc_p)
    else:
        # TODO(synk): large-vocab in-kernel gather (manual DMA / pl.Element rows);
        # fall back to a plain-JAX lookup feeding a flattened bf16 slab.
        x_emb = embed_w[x_idx_p].astype(jnp.bfloat16).reshape(N_pad * L, D)
        kernel = functools.partial(_cnn_text_gathered_kernel, Kmax=Kmax, L=L)
        out = pl.pallas_call(
            kernel,
            out_shape=out_shape,
            grid=(n_blocks,),
            in_specs=[pl.BlockSpec((TB * L, D), lambda i: (i, 0))] + common_specs,
            out_specs=out_spec,
            compiler_params=cparams,
        )(x_emb, w_all, bias_mask, w_fc_p, b_fc_p)

    return out[:N, :C]


def cnn_text_reference(x_idx, embed_w, conv_ws, conv_bs, w_fc, b_fc, Ks):
    """Pure-JAX f32 reference mirroring the PyTorch forward (eval mode)."""
    x = embed_w[x_idx].astype(jnp.float32)                 # (N, L, D)
    N, L, D = x.shape
    feats = []
    for w, b, K in zip(conv_ws, conv_bs, Ks):
        Lout = L - K + 1
        acc = jnp.zeros((N, Lout, w.shape[-1]), jnp.float32)
        for k in range(K):
            acc = acc + jnp.einsum("nld,dc->nlc", x[:, k:k + Lout, :], w[k])
        acc = jax.nn.relu(acc + b[None])                   # (N, Lout, Co)
        feats.append(acc.max(axis=1))                      # (N, Co)
    feat = jnp.concatenate(feats, axis=1)                  # (N, len(Ks)*Co)
    return feat @ w_fc + b_fc                              # (N, C)


if __name__ == "__main__":
    # Small, deterministic synthetic config (args of CNN_Text):
    V = 50          # embed_num
    D = 32          # embed_dim
    Co = 16         # kernel_num
    Ks = [3, 4, 5]  # kernel_sizes
    C = 4           # class_num
    N, L = 2, 16    # batch, sequence length

    key = jax.random.PRNGKey(0)
    k_emb, k_x, k_fc, *k_convs = jax.random.split(key, 3 + len(Ks))

    embed_w = jax.random.normal(k_emb, (V, D), jnp.float32) * 0.1
    conv_ws = []
    conv_bs = []
    for K, kk in zip(Ks, k_convs):
        kw, kb = jax.random.split(kk)
        conv_ws.append(jax.random.normal(kw, (K, D, Co), jnp.float32) * 0.1)
        conv_bs.append(jax.random.normal(kb, (1, Co), jnp.float32) * 0.1)
    kwf, kbf = jax.random.split(k_fc)
    w_fc = jax.random.normal(kwf, (len(Ks) * Co, C), jnp.float32) * 0.1
    b_fc = jax.random.normal(kbf, (1, C), jnp.float32) * 0.1

    x_idx = jax.random.randint(k_x, (N, L), 0, V, dtype=jnp.int32)

    logits = cnn_text_forward(x_idx, embed_w, conv_ws, conv_bs, w_fc, b_fc, Ks)
    logits = jax.block_until_ready(logits)

    ref = cnn_text_reference(x_idx, embed_w, conv_ws, conv_bs, w_fc, b_fc, Ks)
    assert logits.shape == (N, C)
    # bf16 activations/weights with f32 accumulation -> looser tolerance vs f32 ref.
    assert jnp.allclose(logits, ref, atol=1e-2, rtol=1e-2), (logits, ref)

    print("KERNEL_OK")
</pallas_src>

<mosaic_0001>
module attributes {stable_mosaic.version = 11 : i64} {
  func.func @_cnn_text_fused_kernel(%arg0: i32, %arg1: memref<128x1xi32, #tpu.memory_space<vmem>>, %arg2: memref<56x32xbf16, #tpu.memory_space<vmem>>, %arg3: memref<160x128xbf16, #tpu.memory_space<vmem>>, %arg4: memref<16x128xf32, #tpu.memory_space<vmem>>, %arg5: memref<128x128xbf16, #tpu.memory_space<vmem>>, %arg6: memref<1x128xf32, #tpu.memory_space<vmem>>, %arg7: memref<8x128xf32, #tpu.memory_space<vmem>>) attributes {dimension_semantics = [#tpu.dimension_semantics<parallel>], iteration_bounds = array<i64: 1>, scalar_prefetch = 0 : i64, scratch_operands = 0 : i64, tpu.core_type = #tpu.core_type<tc>, window_params = [{transform_indices = @transform_0, window_bounds = array<i64: 128, 1>}, {pipeline_mode = #tpu.pipeline_mode<synchronous>, transform_indices = @transform_1, window_bounds = array<i64: 56, 32>}, {pipeline_mode = #tpu.pipeline_mode<synchronous>, transform_indices = @transform_2, window_bounds = array<i64: 160, 128>}, {pipeline_mode = #tpu.pipeline_mode<synchronous>, transform_indices = @transform_3, window_bounds = array<i64: 16, 128>}, {pipeline_mode = #tpu.pipeline_mode<synchronous>, transform_indices = @transform_4, window_bounds = array<i64: 128, 128>}, {pipeline_mode = #tpu.pipeline_mode<synchronous>, transform_indices = @transform_5, window_bounds = array<i64: 1, 128>}, {transform_indices = @transform_6, window_bounds = array<i64: 8, 128>}]} {
    %c0 = arith.constant 0 : index
    %c0_0 = arith.constant 0 : index
    %0 = vector.load %arg1[%c0, %c0_0] : memref<128x1xi32, #tpu.memory_space<vmem>>, vector<128x1xi32>
    %1 = tpu.iota {dimensions = array<i32: 1>} : vector<128x56xi32>
    %2 = vector.broadcast %0 : vector<128x1xi32> to vector<128x56xi32>
    %3 = arith.cmpi eq, %2, %1 : vector<128x56xi32>
    %4 = arith.extui %3 : vector<128x56xi1> to vector<128x56xi32>
    %5 = arith.sitofp %4 : vector<128x56xi32> to vector<128x56xf32>
    %6 = arith.truncf %5 : vector<128x56xf32> to vector<128x56xbf16>
    %c0_1 = arith.constant 0 : index
    %c0_2 = arith.constant 0 : index
    %7 = vector.load %arg2[%c0_1, %c0_2] : memref<56x32xbf16, #tpu.memory_space<vmem>>, vector<56x32xbf16>
    %cst = arith.constant dense<0.000000e+00> : vector<128x32xf32>
    %8 = tpu.matmul %6, %7, %cst {dimension_numbers = #tpu.dot_dimension_numbers<[1], [0], [0], [1], [0, 0, 1, 1], [], []>} : vector<128x56xbf16>, vector<56x32xbf16>, vector<128x32xf32> -> vector<128x32xf32>
    %c0_3 = arith.constant 0 : index
    %c0_4 = arith.constant 0 : index
    %9 = vector.load %arg3[%c0_3, %c0_4] : memref<160x128xbf16, #tpu.memory_space<vmem>>, vector<160x128xbf16>
    %c0_5 = arith.constant 0 : index
    %c0_6 = arith.constant 0 : index
    %10 = vector.load %arg4[%c0_5, %c0_6] : memref<16x128xf32, #tpu.memory_space<vmem>>, vector<16x128xf32>
    %c0_7 = arith.constant 0 : index
    %c0_8 = arith.constant 0 : index
    %11 = vector.load %arg5[%c0_7, %c0_8] : memref<128x128xbf16, #tpu.memory_space<vmem>>, vector<128x128xbf16>
    %c0_9 = arith.constant 0 : index
    %c0_10 = arith.constant 0 : index
    %12 = vector.load %arg6[%c0_9, %c0_10] : memref<1x128xf32, #tpu.memory_space<vmem>>, vector<1x128xf32>
    %13 = arith.truncf %8 : vector<128x32xf32> to vector<128x32xbf16>
    %c127_i32 = arith.constant 127 : i32
    %14 = tpu.dynamic_rotate %8 by %c127_i32 dim 0 : vector<128x32xf32>, i32 -> vector<128x32xf32>
    %15 = arith.truncf %14 : vector<128x32xf32> to vector<128x32xbf16>
    %c126_i32 = arith.constant 126 : i32
    %16 = tpu.dynamic_rotate %8 by %c126_i32 dim 0 : vector<128x32xf32>, i32 -> vector<128x32xf32>
    %17 = arith.truncf %16 : vector<128x32xf32> to vector<128x32xbf16>
    %c125_i32 = arith.constant 125 : i32
    %18 = tpu.dynamic_rotate %8 by %c125_i32 dim 0 : vector<128x32xf32>, i32 -> vector<128x32xf32>
    %19 = arith.truncf %18 : vector<128x32xf32> to vector<128x32xbf16>
    %c124_i32 = arith.constant 124 : i32
    %20 = tpu.dynamic_rotate %8 by %c124_i32 dim 0 : vector<128x32xf32>, i32 -> vector<128x32xf32>
    %21 = arith.truncf %20 : vector<128x32xf32> to vector<128x32xbf16>
    %22 = tpu.concatenate %13, %15, %17, %19, %21 in 1 : vector<128x32xbf16>, vector<128x32xbf16>, vector<128x32xbf16>, vector<128x32xbf16>, vector<128x32xbf16> -> vector<128x160xbf16>
    %cst_11 = arith.constant dense<0.000000e+00> : vector<128x128xf32>
    %23 = tpu.matmul %22, %9, %cst_11 {dimension_numbers = #tpu.dot_dimension_numbers<[1], [0], [0], [1], [0, 0, 1, 1], [], []>} : vector<128x160xbf16>, vector<160x128xbf16>, vector<128x128xf32> -> vector<128x128xf32>
    %24 = vector.shape_cast %23 : vector<128x128xf32> to vector<8x16x128xf32>
    %25 = vector.shape_cast %10 : vector<16x128xf32> to vector<1x16x128xf32>
    %26 = vector.broadcast %25 : vector<1x16x128xf32> to vector<8x16x128xf32>
    %27 = arith.addf %24, %26 : vector<8x16x128xf32>
    %cst_12 = arith.constant 0.000000e+00 : f32
    %28 = vector.broadcast %cst_12 : f32 to vector<8x16x128xf32>
    %29 = arith.maximumf %27, %28 : vector<8x16x128xf32>
    %cst_13 = arith.constant dense<0xFF800000> : vector<8x128xf32>
    %30 = vector.multi_reduction <maximumf>, %29, %cst_13 [1] : vector<8x16x128xf32> to vector<8x128xf32>
    %31 = arith.truncf %30 : vector<8x128xf32> to vector<8x128xbf16>
    %cst_14 = arith.constant dense<0.000000e+00> : vector<8x128xf32>
    %32 = tpu.matmul %31, %11, %cst_14 {dimension_numbers = #tpu.dot_dimension_numbers<[1], [0], [0], [1], [0, 0, 1, 1], [], []>} : vector<8x128xbf16>, vector<128x128xbf16>, vector<8x128xf32> -> vector<8x128xf32>
    %33 = vector.broadcast %12 : vector<1x128xf32> to vector<8x128xf32>
    %34 = arith.addf %32, %33 : vector<8x128xf32>
    %c0_15 = arith.constant 0 : index
    %c0_16 = arith.constant 0 : index
    %35 = vector.load %arg7[%c0_15, %c0_16] : memref<8x128xf32, #tpu.memory_space<vmem>>, vector<8x128xf32>
    tpu.vector_store %arg7[%c0_15, %c0_16], %34 {strides = array<i32>} : memref<8x128xf32, #tpu.memory_space<vmem>>, vector<8x128xf32>,
    return
  }
  func.func @transform_0(%arg0: i32) -> (i32, i32) {
    %c0_i32 = arith.constant 0 : i32
    %c0_i32_0 = arith.constant 0 : i32
    return %arg0, %c0_i32 : i32, i32
  }
  func.func @transform_1(%arg0: i32) -> (i32, i32) {
    %c0_i32 = arith.constant 0 : i32
    %c0_i32_0 = arith.constant 0 : i32
    %c0_i32_1 = arith.constant 0 : i32
    return %c0_i32, %c0_i32_0 : i32, i32
  }
  func.func @transform_2(%arg0: i32) -> (i32, i32) {
    %c0_i32 = arith.constant 0 : i32
    %c0_i32_0 = arith.constant 0 : i32
    %c0_i32_1 = arith.constant 0 : i32
    return %c0_i32, %c0_i32_0 : i32, i32
  }
  func.func @transform_3(%arg0: i32) -> (i32, i32) {
    %c0_i32 = arith.constant 0 : i32
    %c0_i32_0 = arith.constant 0 : i32
    %c0_i32_1 = arith.constant 0 : i32
    return %c0_i32, %c0_i32_0 : i32, i32
  }
  func.func @transform_4(%arg0: i32) -> (i32, i32) {
    %c0_i32 = arith.constant 0 : i32
    %c0_i32_0 = arith.constant 0 : i32
    %c0_i32_1 = arith.constant 0 : i32
    return %c0_i32, %c0_i32_0 : i32, i32
  }
  func.func @transform_5(%arg0: i32) -> (i32, i32) {
    %c0_i32 = arith.constant 0 : i32
    %c0_i32_0 = arith.constant 0 : i32
    %c0_i32_1 = arith.constant 0 : i32
    return %c0_i32, %c0_i32_0 : i32, i32
  }
  func.func @transform_6(%arg0: i32) -> (i32, i32) {
    %c0_i32 = arith.constant 0 : i32
    %c0_i32_0 = arith.constant 0 : i32
    return %arg0, %c0_i32 : i32, i32
  }
}

</mosaic_0001>

<bundles_post_ra>
// kernel: tpu_custom_call.1
= control target key start
LH: loop header
LB: loop body
LE: loop exit
PB: predicated region body
PF: predicated region fallthrough
CT: control target
= control target key end

     0   :  { %v1247_v2 = vmov 0   ;;  %vm200_vm0 = vcmask 1043456   ;;  %s1942_s0 = inlined_call_operand.vmem [shape: s32[128,1], index: 0, kind: input, shape index: {}]   ;;  %s1943_s1 = inlined_call_operand.vmem [shape: bf16[56,32], index: 1, kind: input, shape index: {}]   ;;  %s1944_s2 = inlined_call_operand.vmem [shape: bf16[160,128], index: 2, kind: input, shape index: {}]   ;;  %s1945_s3 = inlined_call_operand.vmem [shape: f32[16,128], index: 3, kind: input, shape index: {}]   ;;  %s1946_s4 = inlined_call_operand.vmem [shape: bf16[128,128], index: 4, kind: input, shape index: {}]   ;;  %s1947_s5 = inlined_call_operand.vmem [shape: f32[1,128], index: 5, kind: input, shape index: {}]   ;;  %s1948_s6 = inlined_call_operand.hbm [shape: f32[8,128], index: 6, kind: output, shape index: {}]  }
   0x1   :  { %v27_v0 = vld [vmem:[%s1942_s0 + $0x10] sm:$0xff]  ;;  %v25_v1 = vld [vmem:[%s1942_s0] sm:$0xff]  ;;  %1200 = vset.pattern.permute.xlu1 %v1247_v2  ;;  %1199 = vset.pattern.permute.xlu0 %v1247_v2  ;;  %v28_v3 = vld [vmem:[%s1942_s0 + $0x18] sm:$0xff] }
   0x2   :  { %50 = vperm.xlu1 %1200, %v27_v0   ;;  %44 = vperm.xlu0 %1199, %v25_v1   ;;  %v26_v4 = vld [vmem:[%s1942_s0 + $0x8] sm:$0xff]  ;;  %v29_v6 = vld [vmem:[%s1942_s0 + $0x20] sm:$0xff]  ;;  %v1204_v9 = vld [vmem:[%s1943_s1 + $0x18] ss:$0 sps:$4 sm:$0xff]  }
   0x3   :  { %737 = vmatprep.subr.bf16.mxu1 %v1247_v2  ;;  %v30_v5 = vld [vmem:[%s1942_s0 + $0x28] sm:$0xff]  ;;  %v1201_v7 = vld [vmem:[%s1943_s1] sm:$0xff]   ;;  %v32_v10 = vld [vmem:[%s1942_s0 + $0x38] sm:$0xff]  ;;  %v202_v13 = vsel %vm200_vm0, %v1204_v9, 0 }
   0x4   :  { %v1202_v8 = vld [vmem:[%s1943_s1 + $0x8] sm:$0xff]   ;;  %1147 = vmatprep.subr.bf16.mxu0 %v1201_v7  ;;  %v31_v11 = vld [vmem:[%s1942_s0 + $0x30] sm:$0xff]  ;;  %v33_v15 = vld [vmem:[%s1942_s0 + $0x40] sm:$0xff] }
   0x5   :  { %1148 = vmatpush3.bf16.msra.mxu0 %v1201_v7  ;;  %v1203_v12 = vld [vmem:[%s1943_s1 + $0x10] sm:$0xff]   ;;  %v34_v14 = vld [vmem:[%s1942_s0 + $0x48] sm:$0xff]  ;;  %v36_v16 = vld [vmem:[%s1942_s0 + $0x58] sm:$0xff] }
   0x6   :  { %53 = vperm.xlu1 %1200, %v28_v3   ;;  %47 = vperm.xlu0 %1199, %v26_v4   ;;  %v35_v17 = vld [vmem:[%s1942_s0 + $0x50] sm:$0xff] }
   0x7   :  { %1149 = vmatprep.subr.bf16.mxu0 %v1202_v8 }
   0x9   :  { %1150 = vmatpush3.bf16.msra.mxu0 %v1202_v8 }
   0xa   :  { %59 = vperm.xlu1 %1200, %v30_v5   ;;  %56 = vperm.xlu0 %1199, %v29_v6  }
   0xb   :  { %1151 = vmatprep.subr.bf16.mxu0 %v1203_v12 }
   0xd   :  { %1152 = vmatpush3.bf16.msra.mxu0 %v1203_v12 }
   0xe   :  { %65 = vperm.xlu1 %1200, %v32_v10   ;;  %62 = vperm.xlu0 %1199, %v31_v11  }
   0xf   :  { %1191 = vmatprep.subr.msk.bf16.mxu0 %vm200_vm0, %v1204_v9 }
  0x11   :  { %1154 = vmatpush3.bf16.msra.mxu0 %v202_v13 }
  0x12   :  { %71 = vperm.xlu1 %1200, %v34_v14   ;;  %68 = vperm.xlu0 %1199, %v33_v15  }
  0x13   :  { %11 = vsyncpa [#allocation3], 0  ;;  %v38_v18 = vld [vmem:[%s1942_s0 + $0x68] sm:$0xff]  ;;  %v37_v19 = vld [vmem:[%s1942_s0 + $0x60] sm:$0xff]  ;;  %v1949_v20 = vmov 0.0   ;;  %v41_v23 = vlaneseq  ;;  %vm175_vm5 = vcmask 457728  }
  0x14   :  { %1171 = vmatprep.subr.bf16.mxu0 %v1949_v20  ;;  %v40_v21 = vld [vmem:[%s1942_s0 + $0x78] sm:$0xff]  ;;  %v39_v22 = vld [vmem:[%s1942_s0 + $0x70] sm:$0xff]  ;;  %v1205_v1 = vld [vmem:[%s1944_s2] sm:$0xff]   ;;  %s1250_s30 = smov 32   ;;  %s1251_s7 = smov 96  }
  0x15   :  { %v1356_v24 = vand.u32 127, %v41_v23  ;;  %738 = vmatpush1.bf16.msra.mxu1 %v1205_v1  ;;  %v1206_v3 = vld [vmem:[%s1944_s2 + $0x8] sm:$0xff]   ;;  %v1207_v4 = vld [vmem:[%s1944_s2 + $0x10] sm:$0xff]   ;;  %v1208_v5 = vld [vmem:[%s1944_s2 + $0x18] sm:$0xff]   ;;  %v1435_v11 = vshrl.u32 %v41_v23, 7  ;;  %s1253_s1 = smov [#allocation2]  }
  0x16   :  { %77 = vperm.xlu1 %1200, %v36_v16   ;;  %74 = vperm.xlu0 %1199, %v35_v17   ;;  %v1209_v6 = vld [vmem:[%s1944_s2 + $0x20] sm:$0xff]   ;;  %v1210_v7 = vld [vmem:[%s1944_s2 + $0x28] sm:$0xff]   ;;  %v1211_v8 = vld [vmem:[%s1944_s2 + $0x30] sm:$0xff]   ;;  %s1063_s27 = sshll.u32 %s1253_s1, 4  ;;  %s1064_s27 = int_to_ptr.vmem [resolvable:$true] %s1063_s27 }
  0x17   :  { %739 = vmatprep.subr.bf16.mxu1 %v1247_v2  ;;  %v1212_v9 = vld [vmem:[%s1944_s2 + $0x38] sm:$0xff]   ;;  %v1213_v10 = vld [vmem:[%s1944_s2 + $0x40] sm:$0xff]   ;;  %v1214_v12 = vld [vmem:[%s1944_s2 + $0x48] sm:$0xff]   ;;  %s1249_s2 = smov 64   ;;  %s1223_s28 = scalar_lea.vmem %s1064_s27, 128 }
  0x18   :  { %p1224_p0 = scmp.ne.s32.totalorder %s1064_s27, %s1223_s28  ;;  %p1228_p1 = scmp.lt.s32.totalorder %s1064_s27, %s1064_s27 }
  0x19   :  { %740 = vmatpush1.bf16.msra.mxu1 %v1206_v3  ;;  %p1229_p2 = scmp.lt.s32.totalorder %s1223_s28, %s1223_s28 }
  0x1a   :  { %83 = vperm.xlu1 %1200, %v38_v18   ;;  %80 = vperm.xlu0 %1199, %v37_v19  }
  0x1b   :  { %741 = vmatprep.subr.bf16.mxu1 %v1247_v2  ;;  %p1230_p3 = por %p1229_p2, %p1228_p1 }
  0x1d   :  { %742 = vmatpush1.bf16.msra.mxu1 %v1207_v4  ;;  %p1231_p4 = pnand %p1230_p3, %p1224_p0 }
  0x1e   :  { %89 = vperm.xlu1 %1200, %v40_v21   ;;  %86 = vperm.xlu0 %1199, %v39_v22  }
  0x1f   :  { %743 = vmatprep.subr.bf16.mxu1 %v1247_v2 }
  0x21   :  { %744 = vmatpush1.bf16.msra.mxu1 %v1208_v5 }
  0x22   :  { %745 = vmatprep.subr.bf16.mxu1 %v1247_v2 }
  0x25   :  { %746 = vmatpush1.bf16.msra.mxu1 %v1209_v6 }
  0x26   :  { %747 = vmatprep.subr.bf16.mxu1 %v1247_v2 }
  0x29   :  { %748 = vmatpush1.bf16.msra.mxu1 %v1210_v7 }
  0x2a   :  { %749 = vmatprep.subr.bf16.mxu1 %v1247_v2 }
  0x2d   :  { %750 = vmatpush1.bf16.msra.mxu1 %v1211_v8 }
  0x2e   :  { %751 = vmatprep.subr.bf16.mxu1 %v1247_v2 }
  0x31   :  { %752 = vmatpush1.bf16.msra.mxu1 %v1212_v9 }
  0x32   :  { %753 = vmatprep.subr.bf16.mxu1 %v1247_v2 }
  0x35   :  { %754 = vmatpush1.bf16.msra.mxu1 %v1213_v10 }
  0x36   :  { %755 = vmatprep.subr.bf16.mxu1 %v1247_v2 }
  0x39   :  { %756 = vmatpush1.bf16.msra.mxu1 %v1214_v12 }
  0x81   :  { %v51_v25 = vpop.permute.xlu1 %50  ;;  %v45_v26 = vpop.permute.xlu0 %44 }
  0x82   :  { %vm93_vm1 = vcmp.eq.s32.totalorder %v51_v25, %v1356_v24  ;;  %vm91_vm2 = vcmp.eq.s32.totalorder %v45_v26, %v1356_v24 }
  0x83   :  { %v1073_v29 = vsel %vm93_vm1, 1.0, %v1949_v20  ;;  %v1071_v30 = vsel %vm91_vm2, 1.0, %v1949_v20  ;;  %vm489_vm2 = vcmp.lt.s32.totalorder %v1435_v11, 4 }
  0x85   :  { %v54_v27 = vpop.permute.xlu1 %53  ;;  %v48_v28 = vpop.permute.xlu0 %47 }
  0x86   :  { %vm94_vm3 = vcmp.eq.s32.totalorder %v54_v27, %v1356_v24  ;;  %vm92_vm4 = vcmp.eq.s32.totalorder %v48_v28, %v1356_v24 }
  0x87   :  { %v1074_v31 = vsel %vm94_vm3, 1.0, %v1949_v20  ;;  %v1072_v32 = vsel %vm92_vm4, 1.0, %v1949_v20  ;;  %vm407_vm3 = vcmp.lt.s32.totalorder %v1435_v11, 6  ;;  %vm366_vm4 = vcmp.lt.s32.totalorder %v1435_v11, 7 }
  0x88   :  { %v140_v33 = vpack.c.bf16 %v1074_v31, %v1073_v29  ;;  %v139_v34 = vpack.c.bf16 %v1072_v32, %v1071_v30 }
  0x89   :  { %v60_v35 = vpop.permute.xlu1 %59  ;;  %v57_v36 = vpop.permute.xlu0 %56 }
  0x8a   :  { %vm96_vm6 = vcmp.eq.s32.totalorder %v60_v35, %v1356_v24  ;;  %vm95_vm7 = vcmp.eq.s32.totalorder %v57_v36, %v1356_v24  ;;  %1155 = vmatprep.mubr.msk.bf16.mxu0 %vm175_vm5, %v139_v34 }
  0x8b   :  { %v1076_v37 = vsel %vm96_vm6, 1.0, %v1949_v20  ;;  %v1075_v38 = vsel %vm95_vm7, 1.0, %v1949_v20  ;;  %1156 = vmatmul.mubr.msk.bf16.vlgmr.msra.gmra.mrb[0].mxu0 %vm175_vm5, %v140_v33  ;;  %vm586_vm6 = vcmask 261120   ;;  %vm611_vm7 = vcmask 523264  }
  0x8c   :  { %v141_v39 = vpack.c.bf16 %v1076_v37, %v1075_v38 }
  0x8d   :  { %v66_v40 = vpop.permute.xlu1 %65  ;;  %v63_v41 = vpop.permute.xlu0 %62 }
  0x8e   :  { %vm98_vm8 = vcmp.eq.s32.totalorder %v66_v40, %v1356_v24  ;;  %vm97_vm9 = vcmp.eq.s32.totalorder %v63_v41, %v1356_v24  ;;  %1159 = vmatprep.mubr.msk.bf16.mxu0 %vm175_vm5, %v141_v39 }
  0x8f   :  { %v1078_v42 = vsel %vm98_vm8, 1.0, %v1949_v20  ;;  %v1077_v43 = vsel %vm97_vm9, 1.0, %v1949_v20  ;;  %vm628_vm8 = vcmask 785408   ;;  %vm1252_vm9 = vmmov 0  }
  0x90   :  { %v142_v44 = vpack.c.bf16 %v1078_v42, %v1077_v43 }
  0x91   :  { %v72_v45 = vpop.permute.xlu1 %71  ;;  %v69_v46 = vpop.permute.xlu0 %68 }
  0x92   :  { %vm100_vm10 = vcmp.eq.s32.totalorder %v72_v45, %v1356_v24  ;;  %vm99_vm11 = vcmp.eq.s32.totalorder %v69_v46, %v1356_v24 }
  0x93   :  { %v1080_v47 = vsel %vm100_vm10, 1.0, %v1949_v20  ;;  %v1079_v48 = vsel %vm99_vm11, 1.0, %v1949_v20  ;;  %1160 = vmatmul.mubr.msk.bf16.gmra.mrb[4].mxu0 %vm175_vm5, %v142_v44  ;;  %vm952_vm10 = vcmask 1041409   ;;  %vm954_vm11 = vcmask 1042434  }
  0x94   :  { %v143_v49 = vpack.c.bf16 %v1080_v47, %v1079_v48 }
  0x95   :  { %v78_v50 = vpop.permute.xlu1 %77  ;;  %v75_v51 = vpop.permute.xlu0 %74 }
  0x96   :  { %vm102_vm12 = vcmp.eq.s32.totalorder %v78_v50, %v1356_v24  ;;  %vm101_vm13 = vcmp.eq.s32.totalorder %v75_v51, %v1356_v24  ;;  %1163 = vmatprep.mubr.msk.bf16.mxu0 %vm175_vm5, %v143_v49 }
  0x97   :  { %v1082_v52 = vsel %vm102_vm12, 1.0, %v1949_v20  ;;  %v1081_v53 = vsel %vm101_vm13, 1.0, %v1949_v20  ;;  %vm956_vm12 = vcmask 1043459   ;;  %vm958_vm13 = vcmask 1044484  }
  0x98   :  { %v144_v54 = vpack.c.bf16 %v1082_v52, %v1081_v53 }
  0x99   :  { %v84_v55 = vpop.permute.xlu1 %83  ;;  %v81_v56 = vpop.permute.xlu0 %80 }
  0x9a   :  { %vm104_vm14 = vcmp.eq.s32.totalorder %v84_v55, %v1356_v24  ;;  %vm103_vm15 = vcmp.eq.s32.totalorder %v81_v56, %v1356_v24 }
  0x9b   :  { %v1084_v57 = vsel %vm104_vm14, 1.0, %v1949_v20  ;;  %v1083_v58 = vsel %vm103_vm15, 1.0, %v1949_v20  ;;  %1164 = vmatmul.mubr.msk.bf16.gmra.mrb[8].mxu0 %vm175_vm5, %v144_v54  ;;  %vm960_vm14 = vcmask 1045509   ;;  %vm962_vm15 = vcmask 1046534  }
  0x9c   :  { %v145_v59 = vpack.c.bf16 %v1084_v57, %v1083_v58 }
  0x9d   :  { %v90_v60 = vpop.permute.xlu1 %89  ;;  %v87_v61 = vpop.permute.xlu0 %86 }
  0x9e   :  { %vm106_vm0 = vcmp.eq.s32.totalorder %v90_v60, %v1356_v24  ;;  %vm105_vm1 = vcmp.eq.s32.totalorder %v87_v61, %v1356_v24  ;;  %1167 = vmatprep.mubr.msk.bf16.mxu0 %vm175_vm5, %v145_v59 }
  0x9f   :  { %v1086_v62 = vsel %vm106_vm0, 1.0, %v1949_v20  ;;  %v1085_v63 = vsel %vm105_vm1, 1.0, %v1949_v20  ;;  %vm964_vm0 = vcmask 1047559  }
  0xa0   :  { %v146_v0 = vpack.c.bf16 %v1086_v62, %v1085_v63 }
  0xa3   :  { %1168 = vmatmul.mubr.msk.bf16.gmra.mrb[12].mxu0 %vm175_vm5, %v146_v0  ;;  %vm448_vm5 = vcmp.lt.s32.totalorder %v1435_v11, 5 }
 0x15e   :  { %v1440_v13 = vpop.f32.mrb[0].mxu0 }
 0x15f   :  { %v350_v2 = vrot.slane %v1440_v13, 1  ;;  %v393_v14 = vrot.slane %v1440_v13, 2  ;;  %v434_v15 = vrot.slane %v1440_v13, 3  ;;  %v1449_v16 = vpop.f32.mrb[1].mxu0  ;;  %v475_v22 = vrot.slane %v1440_v13, 4 }
 0x160   :  { %v348_v17 = vrot.slane %v1449_v16, 1  ;;  %v391_v18 = vrot.slane %v1449_v16, 2  ;;  %v432_v19 = vrot.slane %v1449_v16, 3  ;;  %v1454_v21 = vpop.f32.mrb[2].mxu0  ;;  %v473_v27 = vrot.slane %v1449_v16, 4 }
 0x161   :  { %v351_v23 = vrot.slane %v1454_v21, 1  ;;  %v394_v24 = vrot.slane %v1454_v21, 2  ;;  %v435_v25 = vrot.slane %v1454_v21, 3  ;;  %v1460_v26 = vpop.f32.mrb[3].mxu0  ;;  %v476_v49 = vrot.slane %v1454_v21, 4 }
 0x162   :  { %v349_v28 = vrot.slane %v1460_v26, 1  ;;  %v392_v29 = vrot.slane %v1460_v26, 2  ;;  %v433_v30 = vrot.slane %v1460_v26, 3  ;;  %v474_v31 = vrot.slane %v1460_v26, 4 }
 0x163   :  { %v379_v32 = vsel %vm366_vm4, %v350_v2, %v351_v23  ;;  %v1471_v33 = vsel %vm407_vm3, %v393_v14, %v394_v24  ;;  %v1475_v34 = vsel %vm448_vm5, %v434_v15, %v435_v25 }
 0x164   :  { %v503_v36 = vsel %vm489_vm2, %v474_v31, %v475_v22  ;;  %v504_v37 = vsel %vm489_vm2, %v473_v27, %v474_v31  ;;  %v421_v38 = vsel %vm407_vm3, %v392_v29, %v393_v14  ;;  %v422_v39 = vsel %vm407_vm3, %v391_v18, %v392_v29 }
 0x165   :  { %v506_v40 = vpack.c.bf16 %v503_v36, %v504_v37  ;;  %v424_v41 = vpack.c.bf16 %v421_v38, %v422_v39  ;;  %v380_v42 = vsel %vm366_vm4, %v349_v28, %v350_v2  ;;  %v381_v43 = vsel %vm366_vm4, %v348_v17, %v349_v28 }
 0x166   :  { %v1499_v44 = vpop.f32.mrb[4].mxu0  ;;  %v383_v45 = vpack.c.bf16 %v380_v42, %v381_v43  ;;  %v462_v46 = vsel %vm448_vm5, %v433_v30, %v434_v15  ;;  %v463_v47 = vsel %vm448_vm5, %v432_v19, %v433_v30 }
 0x167   :  { %v354_v50 = vrot.slane %v1499_v44, 1  ;;  %v397_v51 = vrot.slane %v1499_v44, 2  ;;  %1109 = vmatprep.mubr.msk.bf16.mxu1 %vm586_vm6, %v506_v40  ;;  %546 = vrot.lane.b32.xlu1 %v424_v41, %s1249_s2  ;;  %v1514_v52 = vpop.f32.mrb[5].mxu0  ;;  %v438_v53 = vrot.slane %v1499_v44, 3  ;;  %v479_v58 = vrot.slane %v1499_v44, 4 }
 0x168   :  { %522 = vrot.lane.b32.xlu0 %v383_v45, %s1250_s30  ;;  %v352_v54 = vrot.slane %v1514_v52, 1  ;;  %v395_v55 = vrot.slane %v1514_v52, 2  ;;  %v436_v56 = vrot.slane %v1514_v52, 3  ;;  %v1521_v57 = vpop.f32.mrb[6].mxu0  ;;  %v477_v59 = vrot.slane %v1514_v52, 4 }
 0x169   :  { %v355_v60 = vrot.slane %v1521_v57, 1  ;;  %v398_v61 = vrot.slane %v1521_v57, 2  ;;  %v1527_v62 = vpop.f32.mrb[7].mxu0  ;;  %v439_v63 = vrot.slane %v1521_v57, 3  ;;  %v465_v4 = vpack.c.bf16 %v462_v46, %v463_v47 }
 0x16a   :  { %v353_v0 = vrot.slane %v1527_v62, 1  ;;  %v396_v1 = vrot.slane %v1527_v62, 2  ;;  %v437_v3 = vrot.slane %v1527_v62, 3  ;;  %v378_v5 = vsel %vm366_vm4, %v351_v23, %v352_v54 }
 0x16b   :  { %v419_v6 = vsel %vm407_vm3, %v394_v24, %v395_v55  ;;  %v460_v7 = vsel %vm448_vm5, %v435_v25, %v436_v56  ;;  %v384_v8 = vpack.c.bf16 %v378_v5, %v379_v32  ;;  %v375_v30 = vsel %vm366_vm4, %v354_v50, %v355_v60 }
 0x16c   :  { %v425_v9 = vpack.c.bf16 %v419_v6, %v1471_v33  ;;  %v466_v10 = vpack.c.bf16 %v460_v7, %v1475_v34  ;;  %v376_v12 = vsel %vm366_vm4, %v353_v0, %v354_v50  ;;  %570 = vrot.lane.b32.xlu0 %v465_v4, %s1251_s7  ;;  %v377_v2 = vsel %vm366_vm4, %v352_v54, %v353_v0 }
 0x16d   :  { %v417_v14 = vsel %vm407_vm3, %v396_v1, %v397_v51  ;;  %v418_v15 = vsel %vm407_vm3, %v395_v55, %v396_v1  ;;  %v458_v23 = vsel %vm448_vm5, %v437_v3, %v438_v53  ;;  %524 = vrot.lane.b32.xlu1 %v384_v8, %s1250_s30  ;;  %v385_v25 = vpack.c.bf16 %v376_v12, %v377_v2 }
 0x16e   :  { %v1557_v24 = vpop.f32.mrb[8].mxu0  ;;  %v426_v28 = vpack.c.bf16 %v417_v14, %v418_v15  ;;  %v459_v29 = vsel %vm448_vm5, %v436_v56, %v437_v3  ;;  %v480_v31 = vrot.slane %v1521_v57, 4  ;;  %v478_v32 = vrot.slane %v1527_v62, 4 }
 0x16f   :  { %v358_v33 = vrot.slane %v1557_v24, 1  ;;  %v401_v34 = vrot.slane %v1557_v24, 2  ;;  %v1567_v36 = vpop.f32.mrb[9].mxu0  ;;  %v442_v37 = vrot.slane %v1557_v24, 3  ;;  %v483_v42 = vrot.slane %v1557_v24, 4 }
 0x170   :  { %v356_v38 = vrot.slane %v1567_v36, 1  ;;  %v399_v39 = vrot.slane %v1567_v36, 2  ;;  %v440_v40 = vrot.slane %v1567_v36, 3  ;;  %v1573_v41 = vpop.f32.mrb[10].mxu0  ;;  %548 = vrot.lane.b32.xlu0 %v425_v9, %s1249_s2  ;;  %v481_v43 = vrot.slane %v1567_v36, 4 }
 0x171   :  { %v359_v45 = vrot.slane %v1573_v41, 1  ;;  %v402_v46 = vrot.slane %v1573_v41, 2  ;;  %v1580_v47 = vpop.f32.mrb[11].mxu0  ;;  %v443_v50 = vrot.slane %v1573_v41, 3  ;;  %572 = vrot.lane.b32.xlu1 %v466_v10, %s1251_s7  ;;  %v467_v0 = vpack.c.bf16 %v458_v23, %v459_v29 }
 0x172   :  { %v357_v54 = vrot.slane %v1580_v47, 1  ;;  %v400_v55 = vrot.slane %v1580_v47, 2  ;;  %v441_v56 = vrot.slane %v1580_v47, 3  ;;  %v374_v1 = vsel %vm366_vm4, %v355_v60, %v356_v38 }
 0x173   :  { %v415_v3 = vsel %vm407_vm3, %v398_v61, %v399_v39  ;;  %v416_v4 = vsel %vm407_vm3, %v397_v51, %v398_v61  ;;  %v386_v5 = vpack.c.bf16 %v374_v1, %v375_v30  ;;  %v456_v7 = vsel %vm448_vm5, %v439_v63, %v440_v40 }
 0x174   :  { %v427_v6 = vpack.c.bf16 %v415_v3, %v416_v4  ;;  %v457_v8 = vsel %vm448_vm5, %v438_v53, %v439_v63  ;;  %526 = vrot.lane.b32.xlu0 %v385_v25, %s1250_s30  ;;  %v372_v9 = vsel %vm366_vm4, %v357_v54, %v358_v33  ;;  %v373_v51 = vsel %vm366_vm4, %v356_v38, %v357_v54 }
 0x175   :  { %v468_v60 = vpack.c.bf16 %v456_v7, %v457_v8  ;;  %v413_v61 = vsel %vm407_vm3, %v400_v55, %v401_v34  ;;  %550 = vrot.lane.b32.xlu1 %v426_v28, %s1249_s2  ;;  %v387_v53 = vpack.c.bf16 %v372_v9, %v373_v51  ;;  %v414_v63 = vsel %vm407_vm3, %v399_v39, %v400_v55 }
 0x176   :  { %v1613_v10 = vpop.f32.mrb[12].mxu0  ;;  %v1621_v12 = vsel %vm448_vm5, %v441_v56, %v442_v37  ;;  %v1625_v2 = vsel %vm448_vm5, %v440_v40, %v441_v56  ;;  %v484_v14 = vrot.slane %v1573_v41, 4  ;;  %v482_v15 = vrot.slane %v1580_v47, 4 }
 0x177   :  { %v362_v23 = vrot.slane %v1613_v10, 1  ;;  %v405_v25 = vrot.slane %v1613_v10, 2  ;;  %v1631_v28 = vpop.f32.mrb[13].mxu0  ;;  %v446_v29 = vrot.slane %v1613_v10, 3  ;;  %v487_v54 = vrot.slane %v1613_v10, 4 }
 0x178   :  { %v360_v30 = vrot.slane %v1631_v28, 1  ;;  %v403_v38 = vrot.slane %v1631_v28, 2  ;;  %v444_v39 = vrot.slane %v1631_v28, 3  ;;  %v1637_v40 = vpop.f32.mrb[14].mxu0  ;;  %574 = vrot.lane.b32.xlu0 %v467_v0, %s1251_s7  ;;  %v485_v55 = vrot.slane %v1631_v28, 4 }
 0x179   :  { %v363_v56 = vrot.slane %v1637_v40, 1  ;;  %v406_v1 = vrot.slane %v1637_v40, 2  ;;  %v1644_v3 = vpop.f32.mrb[15].mxu0  ;;  %v447_v4 = vrot.slane %v1637_v40, 3  ;;  %528 = vrot.lane.b32.xlu1 %v386_v5, %s1250_s30  ;;  %v428_v51 = vpack.c.bf16 %v413_v61, %v414_v63 }
 0x17a   :  { %v361_v7 = vrot.slane %v1644_v3, 1  ;;  %v404_v8 = vrot.slane %v1644_v3, 2  ;;  %v445_v9 = vrot.slane %v1644_v3, 3  ;;  %v469_v0 = vpack.c.bf16 %v1621_v12, %v1625_v2 }
 0x17b   :  { %v370_v20 = vsel %vm366_vm4, %v359_v45, %v360_v30  ;;  %v371_v48 = vsel %vm366_vm4, %v358_v33, %v359_v45  ;;  %v411_v5 = vsel %vm407_vm3, %v402_v46, %v403_v38  ;;  %v412_v61 = vsel %vm407_vm3, %v401_v34, %v402_v46 }
 0x17c   :  { %v388_v35 = vpack.c.bf16 %v370_v20, %v371_v48  ;;  %v452_v63 = vsel %vm448_vm5, %v443_v50, %v444_v39  ;;  %552 = vrot.lane.b32.xlu0 %v427_v6, %s1249_s2  ;;  %v429_v12 = vpack.c.bf16 %v411_v5, %v412_v61  ;;  %v453_v33 = vsel %vm448_vm5, %v442_v37, %v443_v50 }
 0x17d   :  { %v368_v20 = vsel %vm366_vm4, %v361_v7, %v362_v23  ;;  %v369_v48 = vsel %vm366_vm4, %v360_v30, %v361_v7  ;;  %576 = vrot.lane.b32.xlu1 %v468_v60, %s1251_s7  ;;  %v470_v34 = vpack.c.bf16 %v452_v63, %v453_v33  ;;  %v409_v46 = vsel %vm407_vm3, %v404_v8, %v405_v25 }
 0x17e   :  { %v389_v45 = vpack.c.bf16 %v368_v20, %v369_v48  ;;  %v410_v6 = vsel %vm407_vm3, %v403_v38, %v404_v8  ;;  %v450_v37 = vsel %vm448_vm5, %v445_v9, %v446_v29  ;;  %v451_v50 = vsel %vm448_vm5, %v444_v39, %v445_v9 }
 0x17f   :  { %v430_v2 = vpack.c.bf16 %v409_v46, %v410_v6  ;;  %v367_v30 = vsel %vm366_vm4, %v362_v23, %v363_v56  ;;  %v471_v7 = vpack.c.bf16 %v450_v37, %v451_v50  ;;  %v382_v60 = vsel %vm366_vm4, %v363_v56, %v348_v17 }
 0x180   :  { %v408_v5 = vsel %vm407_vm3, %v405_v25, %v406_v1  ;;  %v423_v38 = vsel %vm407_vm3, %v406_v1, %v391_v18  ;;  %530 = vrot.lane.b32.xlu0 %v387_v53, %s1250_s30  ;;  %v390_v39 = vpack.c.bf16 %v382_v60, %v367_v30  ;;  %v449_v23 = vsel %vm448_vm5, %v446_v29, %v447_v4 }
 0x181   :  { %v431_v8 = vpack.c.bf16 %v423_v38, %v408_v5  ;;  %v464_v17 = vsel %vm448_vm5, %v447_v4, %v432_v19  ;;  %v488_v56 = vrot.slane %v1637_v40, 4  ;;  %v486_v25 = vrot.slane %v1644_v3, 4  ;;  %554 = vrot.lane.b32.xlu1 %v428_v51, %s1249_s2 }
 0x182   :  { %v472_v9 = vpack.c.bf16 %v464_v17, %v449_v23  ;;  %v501_v18 = vsel %vm489_vm2, %v476_v49, %v477_v59  ;;  %v502_v19 = vsel %vm489_vm2, %v475_v22, %v476_v49  ;;  %v342_v53 = vpack.c.bf16 %v1527_v62, %v1514_v52 }
 0x183   :  { %v499_v29 = vsel %vm489_vm2, %v478_v32, %v479_v58  ;;  %v500_v1 = vsel %vm489_vm2, %v477_v59, %v478_v32  ;;  %v507_v4 = vpack.c.bf16 %v501_v18, %v502_v19  ;;  %v343_v22 = vpack.c.bf16 %v1521_v57, %v1499_v44 }
 0x184   :  { %v508_v51 = vpack.c.bf16 %v499_v29, %v500_v1  ;;  %v497_v49 = vsel %vm489_vm2, %v480_v31, %v481_v43  ;;  %578 = vrot.lane.b32.xlu0 %v469_v0, %s1251_s7  ;;  %v498_v52 = vsel %vm489_vm2, %v479_v58, %v480_v31  ;;  %v344_v59 = vpack.c.bf16 %v1580_v47, %v1567_v36 }
 0x185   :  { %v345_v62 = vpack.c.bf16 %v1573_v41, %v1557_v24  ;;  %v495_v32 = vsel %vm489_vm2, %v482_v15, %v483_v42  ;;  %532 = vrot.lane.b32.xlu1 %v388_v35, %s1250_s30  ;;  %v509_v57 = vpack.c.bf16 %v497_v49, %v498_v52  ;;  %v496_v44 = vsel %vm489_vm2, %v481_v43, %v482_v15 }
 0x186   :  { %v346_v58 = vpack.c.bf16 %v1644_v3, %v1631_v28  ;;  %v1773_v31 = vsel %vm489_vm2, %v484_v14, %v485_v55  ;;  %v510_v35 = vpack.c.bf16 %v495_v32, %v496_v44  ;;  %v494_v36 = vsel %vm489_vm2, %v483_v42, %v484_v14 }
 0x187   :  { %v347_v43 = vpack.c.bf16 %v1637_v40, %v1613_v10  ;;  %v1787_v47 = vsel %vm489_vm2, %v486_v25, %v487_v54  ;;  %v511_v15 = vpack.c.bf16 %v1773_v31, %v494_v36  ;;  %v1794_v0 = vsel %vm489_vm2, %v485_v55, %v486_v25  ;;  %v1216_v10 = vld [vmem:[%s1946_s4 + $0x8] sm:$0xff]   ;;  %v1217_v31 = vld [vmem:[%s1946_s4 + $0x10] sm:$0xff]   ;;  %v1219_v36 = vld [vmem:[%s1946_s4 + $0x20] sm:$0xff]  }
 0x188   :  { %v1800_v42 = vsel %vm489_vm2, %v487_v54, %v488_v56  ;;  %v1806_v14 = vsel %vm489_vm2, %v488_v56, %v473_v27  ;;  %556 = vrot.lane.b32.xlu0 %v429_v12, %s1249_s2  ;;  %v512_v61 = vpack.c.bf16 %v1787_v47, %v1794_v0  ;;  %v1951_v54 = vpack.c.bf16 %v1460_v26, %v1449_v16  ;;  %v1221_v47 = vld [vmem:[%s1946_s4 + $0x30] sm:$0xff]   ;;  %v1904_v0 = vld [vmem:[%s1945_s3] sm:$0xff] }
 0x189   :  { %v513_v55 = vpack.c.bf16 %v1806_v14, %v1800_v42  ;;  %580 = vrot.lane.b32.xlu1 %v470_v34, %s1251_s7  ;;  %v1952_v34 = vpack.c.bf16 %v1454_v21, %v1440_v13  ;;  %v1953_v40 = vmov 0.0   ;;  %v1909_v14 = vld [vmem:[%s1945_s3 + $0x8] sm:$0xff] }
 0x18a   :  { %1187 = vmatprep.mubr.msk.bf16.mxu0 %vm1252_vm9, %v1953_v40 }
 0x18c   :  { %534 = vrot.lane.b32.xlu0 %v389_v45, %s1250_s30 }
 0x18d   :  { %558 = vrot.lane.b32.xlu1 %v430_v2, %s1249_s2 }
 0x190   :  { %582 = vrot.lane.b32.xlu0 %v471_v7, %s1251_s7 }
 0x191   :  { %536 = vrot.lane.b32.xlu1 %v390_v39, %s1250_s30 }
 0x194   :  { %560 = vrot.lane.b32.xlu0 %v431_v8, %s1249_s2 }
 0x195   :  { %584 = vrot.lane.b32.xlu1 %v472_v9, %s1251_s7 }
 0x1d9   :  { %v547_v27 = vpop.permute.xlu1 %546 }
 0x1da   :  { %v523_v11 = vpop.permute.xlu0 %522 }
 0x1db   :  { %v589_v63 = vsel %vm586_vm6, %v1951_v54, %v523_v11 }
 0x1dc   :  { %v613_v33 = vsel %vm611_vm7, %v589_v63, %v547_v27 }
 0x1de   :  { %v571_v12 = vpop.permute.xlu0 %570 }
 0x1df   :  { %v525_v20 = vpop.permute.xlu1 %524  ;;  %v630_v48 = vsel %vm628_vm8, %v613_v33, %v571_v12 }
 0x1e0   :  { %770 = vmatmul.mubr.bf16.vlgmr.msra.gmra.mrb[0].mxu1 %v630_v48  ;;  %v592_v45 = vsel %vm586_vm6, %v1952_v34, %v525_v20 }
 0x1e1   :  { %1110 = vmatprep.mubr.msk.bf16.mxu1 %vm586_vm6, %v507_v4 }
 0x1e2   :  { %v549_v46 = vpop.permute.xlu0 %548 }
 0x1e3   :  { %v573_v16 = vpop.permute.xlu1 %572  ;;  %v615_v26 = vsel %vm611_vm7, %v592_v45, %v549_v46 }
 0x1e4   :  { %v633_v37 = vsel %vm628_vm8, %v615_v26, %v573_v16 }
 0x1e6   :  { %v527_v6 = vpop.permute.xlu0 %526 }
 0x1e7   :  { %v551_v2 = vpop.permute.xlu1 %550  ;;  %v595_v50 = vsel %vm586_vm6, %v342_v53, %v527_v6 }
 0x1e8   :  { %778 = vmatmul.mubr.bf16.gmra.mrb[4].mxu1 %v633_v37  ;;  %v617_v13 = vsel %vm611_vm7, %v595_v50, %v551_v2 }
 0x1e9   :  { %1111 = vmatprep.mubr.msk.bf16.mxu1 %vm586_vm6, %v508_v51 }
 0x1ea   :  { %v575_v30 = vpop.permute.xlu0 %574 }
 0x1eb   :  { %v529_v7 = vpop.permute.xlu1 %528  ;;  %v636_v60 = vsel %vm628_vm8, %v617_v13, %v575_v30 }
 0x1ec   :  { %v598_v38 = vsel %vm586_vm6, %v343_v22, %v529_v7 }
 0x1ee   :  { %v553_v21 = vpop.permute.xlu0 %552 }
 0x1ef   :  { %v577_v5 = vpop.permute.xlu1 %576  ;;  %v619_v8 = vsel %vm611_vm7, %v598_v38, %v553_v21 }
 0x1f0   :  { %786 = vmatmul.mubr.bf16.gmra.mrb[8].mxu1 %v636_v60  ;;  %v639_v17 = vsel %vm628_vm8, %v619_v8, %v577_v5 }
 0x1f1   :  { %1112 = vmatprep.mubr.msk.bf16.mxu1 %vm586_vm6, %v509_v57 }
 0x1f2   :  { %v531_v39 = vpop.permute.xlu0 %530 }
 0x1f3   :  { %v555_v23 = vpop.permute.xlu1 %554  ;;  %v601_v56 = vsel %vm586_vm6, %v344_v59, %v531_v39 }
 0x1f4   :  { %v621_v9 = vsel %vm611_vm7, %v601_v56, %v555_v23 }
 0x1f6   :  { %v579_v25 = vpop.permute.xlu0 %578 }
 0x1f7   :  { %v533_v18 = vpop.permute.xlu1 %532  ;;  %v642_v53 = vsel %vm628_vm8, %v621_v9, %v579_v25 }
 0x1f8   :  { %794 = vmatmul.mubr.bf16.gmra.mrb[12].mxu1 %v639_v17  ;;  %v604_v29 = vsel %vm586_vm6, %v345_v62, %v533_v18 }
 0x1f9   :  { %1113 = vmatprep.mubr.msk.bf16.mxu1 %vm586_vm6, %v510_v35  ;;  %v1218_v35 = vld [vmem:[%s1946_s4 + $0x18] sm:$0xff]  }
 0x1fa   :  { %v557_v19 = vpop.permute.xlu0 %556 }
 0x1fb   :  { %v581_v1 = vpop.permute.xlu1 %580  ;;  %v623_v4 = vsel %vm611_vm7, %v604_v29, %v557_v19 }
 0x1fc   :  { %v645_v22 = vsel %vm628_vm8, %v623_v4, %v581_v1 }
 0x1fe   :  { %v535_v51 = vpop.permute.xlu0 %534 }
 0x1ff   :  { %v559_v49 = vpop.permute.xlu1 %558  ;;  %v607_v52 = vsel %vm586_vm6, %v346_v58, %v535_v51  ;;  %v1215_v58 = vld [vmem:[%s1946_s4] sm:$0xff]  }
 0x200   :  { %802 = vmatmul.mubr.bf16.gmra.mrb[16].mxu1 %v642_v53  ;;  %v625_v41 = vsel %vm611_vm7, %v607_v52, %v559_v49  ;;  %1172 = vmatpush3.bf16.msra.mxu0 %v1215_v58 }
 0x201   :  { %1114 = vmatprep.mubr.msk.bf16.mxu1 %vm586_vm6, %v511_v15  ;;  %1173 = vmatprep.subr.bf16.mxu0 %v1953_v40  ;;  %v1222_v15 = vld [vmem:[%s1946_s4 + $0x38] sm:$0xff]  }
 0x202   :  { %v583_v24 = vpop.permute.xlu0 %582 }
 0x203   :  { %v537_v59 = vpop.permute.xlu1 %536  ;;  %v648_v62 = vsel %vm628_vm8, %v625_v41, %v583_v24 }
 0x204   :  { %v610_v32 = vsel %vm586_vm6, %v347_v43, %v537_v59  ;;  %1174 = vmatpush3.bf16.msra.mxu0 %v1216_v10  ;;  %v1220_v43 = vld [vmem:[%s1946_s4 + $0x28] sm:$0xff]  }
 0x205   :  { %1175 = vmatprep.subr.bf16.mxu0 %v1953_v40 }
 0x206   :  { %v561_v57 = vpop.permute.xlu0 %560 }
 0x207   :  { %v627_v28 = vsel %vm611_vm7, %v610_v32, %v561_v57  ;;  %v585_v3 = vpop.permute.xlu1 %584 }
 0x208   :  { %810 = vmatmul.mubr.bf16.gmra.mrb[20].mxu1 %v645_v22  ;;  %v651_v44 = vsel %vm628_vm8, %v627_v28, %v585_v3  ;;  %1176 = vmatpush3.bf16.msra.mxu0 %v1217_v31 }
 0x209   :  { %1115 = vmatprep.mubr.msk.bf16.mxu1 %vm586_vm6, %v512_v61  ;;  %1177 = vmatprep.subr.bf16.mxu0 %v1953_v40 }
 0x20c   :  { %1178 = vmatpush3.bf16.msra.mxu0 %v1218_v35 }
 0x20d   :  { %1179 = vmatprep.subr.bf16.mxu0 %v1953_v40 }
 0x210   :  { %818 = vmatmul.mubr.bf16.gmra.mrb[24].mxu1 %v648_v62  ;;  %1180 = vmatpush3.bf16.msra.mxu0 %v1219_v36 }
 0x211   :  { %1116 = vmatprep.mubr.msk.bf16.mxu1 %vm586_vm6, %v513_v55  ;;  %1181 = vmatprep.subr.bf16.mxu0 %v1953_v40 }
 0x214   :  { %1182 = vmatpush3.bf16.msra.mxu0 %v1220_v43 }
 0x215   :  { %1183 = vmatprep.subr.bf16.mxu0 %v1953_v40 }
 0x218   :  { %826 = vmatmul.mubr.bf16.gmra.mrb[28].mxu1 %v651_v44  ;;  %1184 = vmatpush3.bf16.msra.mxu0 %v1221_v47 }
 0x219   :  { %1185 = vmatprep.subr.bf16.mxu0 %v1953_v40 }
 0x21c   :  { %1186 = vmatpush3.bf16.msra.mxu0 %v1222_v15 }
 0x2b3   :  { %v771_v42 = vpop.f32.mrb[0].mxu1 }
 0x2b4   :  { %v834_v61 = vadd.f32 %v771_v42, %v1904_v0  ;;  %v773_v55 = vpop.f32.mrb[1].mxu1 }
 0x2b5   :  { %v774_v11 = vpop.f32.mrb[2].mxu1 }
 0x2b6   :  { %v835_v27 = vadd.f32 %v774_v11, %v1909_v14  ;;  %v776_v54 = vpop.f32.mrb[3].mxu1  ;;  %v850_v63 = vmax.f32 %v834_v61, 0.0 }
 0x2b8   :  { %v851_v12 = vmax.f32 %v835_v27, 0.0 }
 0x2ba   :  { %v866_v33 = vmax.f32 %v850_v63, %v851_v12 }
 0x2bb   :  { %v779_v20 = vpop.f32.mrb[4].mxu1 }
 0x2bc   :  { %v867_v48 = vrot.slane %v866_v33, 4  ;;  %v836_v34 = vadd.f32 %v779_v20, %v1904_v0  ;;  %v781_v45 = vpop.f32.mrb[5].mxu1 }
 0x2bd   :  { %v782_v46 = vpop.f32.mrb[6].mxu1 }
 0x2be   :  { %v868_v16 = vmax.f32 %v866_v33, %v867_v48  ;;  %v837_v26 = vadd.f32 %v782_v46, %v1909_v14  ;;  %v784_v6 = vpop.f32.mrb[7].mxu1  ;;  %v852_v37 = vmax.f32 %v836_v34, 0.0 }
 0x2c0   :  { %v869_v2 = vrot.slane %v868_v16, 2  ;;  %v853_v50 = vmax.f32 %v837_v26, 0.0 }
 0x2c2   :  { %v870_v30 = vmax.f32 %v868_v16, %v869_v2  ;;  %v873_v7 = vmax.f32 %v852_v37, %v853_v50 }
 0x2c3   :  { %v787_v13 = vpop.f32.mrb[8].mxu1 }
 0x2c4   :  { %v874_v21 = vrot.slane %v873_v7, 4  ;;  %v838_v60 = vadd.f32 %v787_v13, %v1904_v0  ;;  %v789_v5 = vpop.f32.mrb[9].mxu1  ;;  %v871_v39 = vrot.slane %v870_v30, 1 }
 0x2c5   :  { %v790_v38 = vpop.f32.mrb[10].mxu1 }
 0x2c6   :  { %v875_v8 = vmax.f32 %v873_v7, %v874_v21  ;;  %v839_v23 = vadd.f32 %v790_v38, %v1909_v14  ;;  %v792_v17 = vpop.f32.mrb[11].mxu1  ;;  %v854_v25 = vmax.f32 %v838_v60, 0.0  ;;  %v872_v18 = vmax.f32 %v870_v30, %v871_v39 }
 0x2c8   :  { %v876_v56 = vrot.slane %v875_v8, 2  ;;  %v855_v9 = vmax.f32 %v839_v23, 0.0  ;;  %v922_v52 = vpack.c.bf16 %v872_v18, %v872_v18 }
 0x2ca   :  { %v877_v19 = vmax.f32 %v875_v8, %v876_v56  ;;  %v880_v53 = vmax.f32 %v854_v25, %v855_v9  ;;  %v944_v44 = vunpack.c.l.b16 %v922_v52 }
 0x2cb   :  { %v795_v29 = vpop.f32.mrb[12].mxu1 }
 0x2cc   :  { %v878_v1 = vrot.slane %v877_v19, 1  ;;  %v881_v4 = vrot.slane %v880_v53, 4  ;;  %v840_v51 = vadd.f32 %v795_v29, %v1904_v0  ;;  %v797_v22 = vpop.f32.mrb[13].mxu1 }
 0x2cd   :  { %v798_v49 = vpop.f32.mrb[14].mxu1 }
 0x2ce   :  { %v879_v24 = vmax.f32 %v877_v19, %v878_v1  ;;  %v882_v41 = vmax.f32 %v880_v53, %v881_v4  ;;  %v841_v59 = vadd.f32 %v798_v49, %v1909_v14  ;;  %v800_v62 = vpop.f32.mrb[15].mxu1  ;;  %v856_v28 = vmax.f32 %v840_v51, 0.0 }
 0x2d0   :  { %v923_v32 = vpack.c.bf16 %v879_v24, %v879_v24  ;;  %v883_v57 = vrot.slane %v882_v41, 2  ;;  %v857_v3 = vmax.f32 %v841_v59, 0.0 }
 0x2d2   :  { %v945_v58 = vunpack.c.l.b16 %v923_v32  ;;  %v884_v10 = vmax.f32 %v882_v41, %v883_v57  ;;  %v887_v40 = vmax.f32 %v856_v28, %v857_v3 }
 0x2d3   :  { %v803_v31 = vpop.f32.mrb[16].mxu1 }
 0x2d4   :  { %v953_v35 = vsel %vm952_vm10, %v945_v58, %v944_v44  ;;  %v885_v36 = vrot.slane %v884_v10, 1  ;;  %v888_v43 = vrot.slane %v887_v40, 4  ;;  %v842_v47 = vadd.f32 %v803_v31, %v1904_v0  ;;  %v805_v15 = vpop.f32.mrb[17].mxu1 }
 0x2d5   :  { %v806_v42 = vpop.f32.mrb[18].mxu1 }
 0x2d6   :  { %v886_v61 = vmax.f32 %v884_v10, %v885_v36  ;;  %v889_v55 = vmax.f32 %v887_v40, %v888_v43  ;;  %v843_v11 = vadd.f32 %v806_v42, %v1909_v14  ;;  %v808_v27 = vpop.f32.mrb[19].mxu1  ;;  %v858_v12 = vmax.f32 %v842_v47, 0.0 }
 0x2d8   :  { %v924_v54 = vpack.c.bf16 %v886_v61, %v886_v61  ;;  %v890_v63 = vrot.slane %v889_v55, 2  ;;  %v859_v33 = vmax.f32 %v843_v11, 0.0 }
 0x2da   :  { %v946_v20 = vunpack.c.l.b16 %v924_v54  ;;  %v891_v48 = vmax.f32 %v889_v55, %v890_v63  ;;  %v894_v34 = vmax.f32 %v858_v12, %v859_v33 }
 0x2db   :  { %v811_v45 = vpop.f32.mrb[20].mxu1 }
 0x2dc   :  { %v955_v46 = vsel %vm954_vm11, %v946_v20, %v953_v35  ;;  %v892_v16 = vrot.slane %v891_v48, 1  ;;  %v895_v26 = vrot.slane %v894_v34, 4  ;;  %v844_v6 = vadd.f32 %v811_v45, %v1904_v0  ;;  %v813_v2 = vpop.f32.mrb[21].mxu1 }
 0x2dd   :  { %v814_v37 = vpop.f32.mrb[22].mxu1 }
 0x2de   :  { %v893_v50 = vmax.f32 %v891_v48, %v892_v16  ;;  %v896_v30 = vmax.f32 %v894_v34, %v895_v26  ;;  %v845_v7 = vadd.f32 %v814_v37, %v1909_v14  ;;  %v816_v13 = vpop.f32.mrb[23].mxu1  ;;  %v860_v5 = vmax.f32 %v844_v6, 0.0  ;;  %v1117_v37 = vld [vmem:[%s1947_s5] ss:$0 sm:$0xff] }
 0x2e0   :  { %v925_v21 = vpack.c.bf16 %v893_v50, %v893_v50  ;;  %v897_v60 = vrot.slane %v896_v30, 2  ;;  %v861_v38 = vmax.f32 %v845_v7, 0.0 }
 0x2e2   :  { %v947_v39 = vunpack.c.l.b16 %v925_v21  ;;  %v898_v8 = vmax.f32 %v896_v30, %v897_v60  ;;  %v901_v23 = vmax.f32 %v860_v5, %v861_v38 }
 0x2e3   :  { %v819_v17 = vpop.f32.mrb[24].mxu1 }
 0x2e4   :  { %v957_v56 = vsel %vm956_vm12, %v947_v39, %v955_v46  ;;  %v899_v25 = vrot.slane %v898_v8, 1  ;;  %v902_v9 = vrot.slane %v901_v23, 4  ;;  %v846_v18 = vadd.f32 %v819_v17, %v1904_v0  ;;  %v821_v19 = vpop.f32.mrb[25].mxu1 }
 0x2e5   :  { %v822_v53 = vpop.f32.mrb[26].mxu1 }
 0x2e6   :  { %v900_v29 = vmax.f32 %v898_v8, %v899_v25  ;;  %v903_v1 = vmax.f32 %v901_v23, %v902_v9  ;;  %v847_v4 = vadd.f32 %v822_v53, %v1909_v14  ;;  %v824_v51 = vpop.f32.mrb[27].mxu1  ;;  %v862_v52 = vmax.f32 %v846_v18, 0.0 }
 0x2e8   :  { %v926_v22 = vpack.c.bf16 %v900_v29, %v900_v29  ;;  %v904_v49 = vrot.slane %v903_v1, 2  ;;  %v863_v24 = vmax.f32 %v847_v4, 0.0 }
 0x2ea   :  { %v948_v41 = vunpack.c.l.b16 %v926_v22  ;;  %v905_v59 = vmax.f32 %v903_v1, %v904_v49  ;;  %v908_v62 = vmax.f32 %v862_v52, %v863_v24 }
 0x2eb   :  { %v827_v32 = vpop.f32.mrb[28].mxu1 }
 0x2ec   :  { %v959_v57 = vsel %vm958_vm13, %v948_v41, %v957_v56  ;;  %v906_v28 = vrot.slane %v905_v59, 1  ;;  %v909_v3 = vrot.slane %v908_v62, 4  ;;  %v848_v44 = vadd.f32 %v827_v32, %v1904_v0  ;;  %v829_v58 = vpop.f32.mrb[29].mxu1 }
 0x2ed   :  { %v830_v10 = vpop.f32.mrb[30].mxu1 }
 0x2ee   :  { %v907_v40 = vmax.f32 %v905_v59, %v906_v28  ;;  %v910_v31 = vmax.f32 %v908_v62, %v909_v3  ;;  %v849_v35 = vadd.f32 %v830_v10, %v1909_v14  ;;  %v832_v36 = vpop.f32.mrb[31].mxu1  ;;  %v864_v15 = vmax.f32 %v848_v44, 0.0 }
 0x2f0   :  { %v927_v43 = vpack.c.bf16 %v907_v40, %v907_v40  ;;  %v911_v47 = vrot.slane %v910_v31, 2  ;;  %v865_v42 = vmax.f32 %v849_v35, 0.0 }
 0x2f2   :  { %v949_v61 = vunpack.c.l.b16 %v927_v43  ;;  %v912_v55 = vmax.f32 %v910_v31, %v911_v47  ;;  %v915_v11 = vmax.f32 %v864_v15, %v865_v42 }
 0x2f4   :  { %v961_v27 = vsel %vm960_vm14, %v949_v61, %v959_v57  ;;  %v913_v54 = vrot.slane %v912_v55, 1  ;;  %v916_v63 = vrot.slane %v915_v11, 4 }
 0x2f6   :  { %v914_v12 = vmax.f32 %v912_v55, %v913_v54  ;;  %v917_v0 = vmax.f32 %v915_v11, %v916_v63 }
 0x2f8   :  { %v928_v33 = vpack.c.bf16 %v914_v12, %v914_v12  ;;  %v918_v20 = vrot.slane %v917_v0, 2 }
 0x2fa   :  { %v950_v48 = vunpack.c.l.b16 %v928_v33  ;;  %v919_v34 = vmax.f32 %v917_v0, %v918_v20 }
 0x2fc   :  { %v920_v14 = vrot.slane %v919_v34, 1  ;;  %v963_v45 = vsel %vm962_vm15, %v950_v48, %v961_v27 }
 0x2fe   :  { %v921_v46 = vmax.f32 %v919_v34, %v920_v14 }
 0x300   :  { %v929_v16 = vpack.c.bf16 %v921_v46, %v921_v46 }
 0x302   :  { %v951_v26 = vunpack.c.l.b16 %v929_v16 }
 0x304   :  { %v965_v6 = vsel %vm964_vm0, %v951_v26, %v963_v45 }
 0x305   :  { %v966_v2 = vpack.c.b16 %v965_v6, %v965_v6 }
 0x307   :  { %1188 = vmatmul.mubr.bf16.vlgmr.msra.gmra.mrb[16].mxu0 %v966_v2 }
 0x3da   :  { %v1050_v50 = vpop.f32.mrb[16].mxu0 }
 0x3db   :  { %v1051_v30 = vadd.f32 %v1117_v37, %v1050_v50  ;;  %v1189_v7 = vpop.f32.mrb[17].mxu0 }
 0x3dc   :  { %v1053_v13 = vpop.f32.mrb[18].mxu0 }
 0x3dd   :  { %1056 = vst [vmem:[#allocation2] sm:$0xff] %v1051_v30  ;;  %v1190_v21 = vpop.f32.mrb[19].mxu0 }
 0x3de   :  { %1234 = shalt.err (!%p1231_p4)
}
 0x3df   :  { %s1235_s5 = scalar_lea.hbm %s1948_s6, 128 }
 0x3e0   :  { %p1236_p5 = scmp.ne.s32.totalorder %s1948_s6, %s1235_s5  ;;  %p1239_p6 = scmp.lt.u32.totalorder %s1235_s5, %s1948_s6 }
 0x3e2   :  { %p1241_p7 = pnand %p1239_p6, %p1236_p5 }
 0x3e4   :  { %1244 = shalt.err (!%p1241_p7)
}
 0x3e5   :  { %1066 = dma.vmem_to_hbm [thread:$0]  %s1064_s27, 128, %s1948_s6, [#allocation3]  }
 0x3e6   :  { %1245 = dma.done.wait [#allocation3], 128  }
 0x3e7   :  { %1246 = vsyncadd [#allocation3], 4294967168 }
 0x3e8   :  { %1070 = vsyncpa [#allocation3], 1 }

</bundles_post_ra>
